<compile_context>
chip_gen: v5e
topology: v5e:2x2
jax: 0.10.0
libtpu: 0.0.40
codegen_flags: <defaults>
</compile_context>

<pallas_src>
import jax
import jax.numpy as jnp
from jax.experimental import pallas as pl
from jax.experimental.pallas import tpu as pltpu


def _round_up(x, m):
    return (x + m - 1) // m * m


def _cdiv(a, b):
    return -(-a // b)


def _proj_kernel(a_ref, w_ref, b_ref, o_ref):
    # a_ref: (TM, Kp) activations (compute dtype)
    # w_ref: (Kp, Ep) weights     (compute dtype)  -- VMEM-resident across grid
    # b_ref: (1, Ep)  bias        (f32)            -- VMEM-resident across grid
    # o_ref: (TM, Ep) output      (f32)
    acc = jnp.dot(a_ref[...], w_ref[...], preferred_element_type=jnp.float32)
    o_ref[...] = (acc + b_ref[...]).astype(o_ref.dtype)


def patch_embed(x, weight, bias, patch_size, *,
                compute_dtype=jnp.bfloat16, tm_max=512):
    """x: (B, C, H, W). weight: (E, C, p, p). bias: (E,). -> (B, n_patches, E) f32."""
    B, C, H, W = x.shape
    E = weight.shape[0]
    p = patch_size
    nH, nW = H // p, W // p
    n_patches = nH * nW
    K = C * p * p
    M = B * n_patches

    # Conv2d with stride == kernel floor-drops trailing rows/cols; match that.
    if H != nH * p or W != nW * p:
        x = x[:, :, :nH * p, :nW * p]

    # Lane-dense padding: contraction dim and output dim up to multiples of 128.
    Kp = _round_up(K, 128)
    Ep = _round_up(E, 128)

    # --- glue: extract patches, flatten each patch in (c, kh, kw) order,
    #     cast to MXU compute dtype and zero-pad K in the same pass. ---
    patches = x.reshape(B, C, nH, p, nW, p)
    patches = jnp.transpose(patches, (0, 2, 4, 1, 3, 5))
    patches = patches.reshape(M, K).astype(compute_dtype)
    if Kp != K:
        patches = jnp.pad(patches, ((0, 0), (0, Kp - K)))

    # Conv weight (E, C, p, p) -> matmul weight (K, E) (same (c,kh,kw) order),
    # zero-padded to (Kp, Ep). Bias stays f32 (added post-accumulation).
    w_mat = weight.reshape(E, K).T.astype(compute_dtype)
    if (Kp, Ep) != (K, E):
        w_mat = jnp.pad(w_mat, ((0, Kp - K), (0, Ep - E)))
    b_mat = bias.astype(jnp.float32).reshape(1, E)
    if Ep != E:
        b_mat = jnp.pad(b_mat, ((0, 0), (0, Ep - E)))

    # --- pick TM: balanced tiles (minimal M padding), bounded by tm_max and
    #     a conservative VMEM budget. ---
    itemsize = jnp.dtype(compute_dtype).itemsize

    def _vmem_bytes(tm):
        # double-buffered A + out tiles, (conservatively 2x) resident W, bias.
        return (2 * (tm * Kp * itemsize + tm * Ep * 4)
                + 2 * Kp * Ep * itemsize + 2 * Ep * 4)

    n_tiles = max(1, _cdiv(M, tm_max))
    TM = _round_up(_cdiv(M, n_tiles), 8)
    while TM > 8 and _vmem_bytes(TM) > 16 * 1024 * 1024:
        TM = _round_up(TM // 2, 8)

    Mp = _round_up(M, TM)
    if Mp != M:
        patches = jnp.pad(patches, ((0, Mp - M), (0, 0)))

    grid_m = Mp // TM

    out = pl.pallas_call(
        _proj_kernel,
        out_shape=jax.ShapeDtypeStruct((Mp, Ep), jnp.float32),
        grid_spec=pltpu.PrefetchScalarGridSpec(
            num_scalar_prefetch=0,
            grid=(grid_m,),
            in_specs=[
                pl.BlockSpec((TM, Kp), lambda i: (i, 0)),   # activation tiles
                pl.BlockSpec((Kp, Ep), lambda i: (0, 0)),   # weight: VMEM-resident
                pl.BlockSpec((1, Ep), lambda i: (0, 0)),    # bias:   VMEM-resident
            ],
            out_specs=pl.BlockSpec((TM, Ep), lambda i: (i, 0)),
        ),
        compiler_params=pltpu.CompilerParams(
            dimension_semantics=("parallel",),
        ),
        cost_estimate=pl.CostEstimate(
            flops=2 * Mp * Kp * Ep,
            transcendentals=0,
            bytes_accessed=(Mp * Kp * itemsize + Kp * Ep * itemsize
                            + Mp * Ep * 4 + Ep * 4),
        ),
    )(patches, w_mat, b_mat)

    # Strip the M / E padding and restore (B, n_patches, E).
    return out[:M, :E].reshape(B, n_patches, E)


if __name__ == "__main__":
    # Module defaults: img_size=28, patch_size=7, in_chans=1, embed_dim=64
    img_size, patch_size, in_chans, embed_dim = 28, 7, 1, 64
    batch = 2

    key = jax.random.PRNGKey(0)
    kx, kw, kb = jax.random.split(key, 3)

    x = jax.random.normal(kx, (batch, in_chans, img_size, img_size), jnp.float32)
    weight = jax.random.normal(
        kw, (embed_dim, in_chans, patch_size, patch_size), jnp.float32) * 0.02
    bias = jax.random.normal(kb, (embed_dim,), jnp.float32) * 0.02

    # Reference: lax conv (== nn.Conv2d, stride=kernel) -> flatten(2) -> transpose
    ref = jax.lax.conv_general_dilated(
        x, weight, window_strides=(patch_size, patch_size), padding="VALID",
        dimension_numbers=("NCHW", "OIHW", "NCHW"))
    ref = ref + bias[None, :, None, None]
    ref = ref.reshape(batch, embed_dim, -1).transpose(0, 2, 1)

    n_patches = (img_size // patch_size) ** 2

    # f32 MXU operands: exact-ish match.
    out_f32 = patch_embed(x, weight, bias, patch_size, compute_dtype=jnp.float32)
    out_f32 = jax.block_until_ready(out_f32)
    assert out_f32.shape == (batch, n_patches, embed_dim)
    assert jnp.allclose(out_f32, ref, atol=1e-4, rtol=1e-4)

    # bf16 MXU operands (default fast path on v6e/v7x): looser tolerance.
    out_bf16 = patch_embed(x, weight, bias, patch_size)
    out_bf16 = jax.block_until_ready(out_bf16)
    assert out_bf16.shape == (batch, n_patches, embed_dim)
    assert jnp.allclose(out_bf16, ref, atol=1e-2, rtol=1e-2)

    # Multi-tile grid path (grid_m > 1) exercised with a small tm_max.
    out_tiled = patch_embed(x, weight, bias, patch_size,
                            compute_dtype=jnp.float32, tm_max=16)
    out_tiled = jax.block_until_ready(out_tiled)
    assert out_tiled.shape == (batch, n_patches, embed_dim)
    assert jnp.allclose(out_tiled, ref, atol=1e-4, rtol=1e-4)

    print("KERNEL_OK")
</pallas_src>

<mosaic_0001>
module attributes {stable_mosaic.version = 11 : i64} {
  func.func @_proj_kernel(%arg0: i32, %arg1: memref<32x128xf32, #tpu.memory_space<vmem>>, %arg2: memref<128x128xf32, #tpu.memory_space<vmem>>, %arg3: memref<1x128xf32, #tpu.memory_space<vmem>>, %arg4: memref<32x128xf32, #tpu.memory_space<vmem>>) attributes {dimension_semantics = [#tpu.dimension_semantics<parallel>], iteration_bounds = array<i64: 1>, scalar_prefetch = 0 : i64, scratch_operands = 0 : i64, tpu.core_type = #tpu.core_type<tc>, window_params = [{transform_indices = @transform_0, window_bounds = array<i64: 32, 128>}, {pipeline_mode = #tpu.pipeline_mode<synchronous>, transform_indices = @transform_1, window_bounds = array<i64: 128, 128>}, {pipeline_mode = #tpu.pipeline_mode<synchronous>, transform_indices = @transform_2, window_bounds = array<i64: 1, 128>}, {transform_indices = @transform_3, window_bounds = array<i64: 32, 128>}]} {
    %c0 = arith.constant 0 : index
    %c0_0 = arith.constant 0 : index
    %0 = vector.load %arg1[%c0, %c0_0] : memref<32x128xf32, #tpu.memory_space<vmem>>, vector<32x128xf32>
    %c0_1 = arith.constant 0 : index
    %c0_2 = arith.constant 0 : index
    %1 = vector.load %arg2[%c0_1, %c0_2] : memref<128x128xf32, #tpu.memory_space<vmem>>, vector<128x128xf32>
    %cst = arith.constant dense<0.000000e+00> : vector<32x128xf32>
    %2 = tpu.matmul %0, %1, %cst {dimension_numbers = #tpu.dot_dimension_numbers<[1], [0], [0], [1], [0, 0, 1, 1], [], []>} : vector<32x128xf32>, vector<128x128xf32>, vector<32x128xf32> -> vector<32x128xf32>
    %c0_3 = arith.constant 0 : index
    %c0_4 = arith.constant 0 : index
    %3 = vector.load %arg3[%c0_3, %c0_4] : memref<1x128xf32, #tpu.memory_space<vmem>>, vector<1x128xf32>
    %4 = vector.broadcast %3 : vector<1x128xf32> to vector<32x128xf32>
    %5 = arith.addf %2, %4 : vector<32x128xf32>
    %c0_5 = arith.constant 0 : index
    %c0_6 = arith.constant 0 : index
    %6 = vector.load %arg4[%c0_5, %c0_6] : memref<32x128xf32, #tpu.memory_space<vmem>>, vector<32x128xf32>
    tpu.vector_store %arg4[%c0_5, %c0_6], %5 {strides = array<i32>} : memref<32x128xf32, #tpu.memory_space<vmem>>, vector<32x128xf32>,
    return
  }
  func.func @transform_0(%arg0: i32) -> (i32, i32) {
    %c0_i32 = arith.constant 0 : i32
    %c0_i32_0 = arith.constant 0 : i32
    return %arg0, %c0_i32 : i32, i32
  }
  func.func @transform_1(%arg0: i32) -> (i32, i32) {
    %c0_i32 = arith.constant 0 : i32
    %c0_i32_0 = arith.constant 0 : i32
    %c0_i32_1 = arith.constant 0 : i32
    return %c0_i32, %c0_i32_0 : i32, i32
  }
  func.func @transform_2(%arg0: i32) -> (i32, i32) {
    %c0_i32 = arith.constant 0 : i32
    %c0_i32_0 = arith.constant 0 : i32
    %c0_i32_1 = arith.constant 0 : i32
    return %c0_i32, %c0_i32_0 : i32, i32
  }
  func.func @transform_3(%arg0: i32) -> (i32, i32) {
    %c0_i32 = arith.constant 0 : i32
    %c0_i32_0 = arith.constant 0 : i32
    return %arg0, %c0_i32 : i32, i32
  }
}

</mosaic_0001>

<bundles_post_ra>
// kernel: tpu_custom_call.1
= control target key start
LH: loop header
LB: loop body
LE: loop exit
PB: predicated region body
PF: predicated region fallthrough
CT: control target
= control target key end

     0   :  { %8 = vsyncpa [#allocation3], 0  ;;  %s302_s0 = inlined_call_operand.hbm [shape: f32[32,128], index: 0, kind: input, shape index: {}]   ;;  %s303_s1 = inlined_call_operand.hbm [shape: f32[128,128], index: 1, kind: input, shape index: {}]   ;;  %s304_s2 = inlined_call_operand.vmem [shape: f32[1,128], index: 2, kind: input, shape index: {}]   ;;  %s305_s3 = inlined_call_operand.hbm [shape: f32[32,128], index: 3, kind: output, shape index: {}]  }
   0x1   :  { %9 = vsyncpa [#allocation6], 0 }
   0x2   :  { %10 = vsyncpa [#allocation4], 0  ;;  %s15_s14 = sshll.u32 %s302_s0, 4  ;;  %s256_s15 = smov [#allocation2]   ;;  %s16_s14 = int_to_ptr.hbm [resolvable:$true] %s15_s14 }
   0x3   :  { %s17_s16 = sshll.u32 %s256_s15, 4  ;;  %s28_s19 = sshll.u32 %s303_s1, 4  ;;  %s18_s16 = int_to_ptr.vmem [resolvable:$true] %s17_s16  ;;  %s29_s19 = int_to_ptr.hbm [resolvable:$true] %s28_s19 }
   0x4   :  { %s257_s20 = smov 128   ;;  %s258_s21 = smov 8  }
   0x5   :  { %23 = dma.hbm_to_vmem [thread:$0]  %s16_s14, 512, %s18_s16, [#allocation3], %s257_s20, %s257_s20, %s258_s21  }
   0x6   :  { %s259_s22 = smov [#allocation5]  }
   0x7   :  { %s30_s23 = sshll.u32 %s259_s22, 4  ;;  %s31_s23 = int_to_ptr.vmem [resolvable:$true] %s30_s23 }
   0x8   :  { %36 = dma.hbm_to_vmem [thread:$0]  %s29_s19, 2048, %s31_s23, [#allocation6], %s257_s20, %s257_s20, %s258_s21  }
   0x9   :  { %250 = dma.done.wait [#allocation3], 512  }
   0xa   :  { %251 = vsyncadd [#allocation3], 4294966784 }
   0xb   :  { %252 = dma.done.wait [#allocation6], 2048  }
   0xc   :  { %253 = vsyncadd [#allocation6], 4294965248  ;;  %v66_v0 = vld [vmem:[#allocation5 + $0x78] sm:$0xff]  ;;  %v65_v1 = vld [vmem:[#allocation5 + $0x70] sm:$0xff]  ;;  %s260_s24 = smov [#allocation7]   ;;  %s110_s28 = sshll.u32 %s305_s3, 4  ;;  %s111_s28 = int_to_ptr.hbm [resolvable:$true] %s110_s28 }
   0xd   :  { %125 = vmatpush.msra.mxu2 %v66_v0  ;;  %126 = vmatpush.msra.mxu3 %v66_v0  ;;  %v64_v2 = vld [vmem:[#allocation5 + $0x68] sm:$0xff]  ;;  %v63_v3 = vld [vmem:[#allocation5 + $0x60] sm:$0xff]  ;;  %v62_v4 = vld [vmem:[#allocation5 + $0x58] sm:$0xff]  ;;  %s108_s25 = sshll.u32 %s260_s24, 4  ;;  %s109_s25 = int_to_ptr.vmem [resolvable:$true] %s108_s25 }
   0xe   :  { %71 = vmatpush.msra.mxu0 %v66_v0  ;;  %124 = vmatpush.msra.mxu1 %v66_v0  ;;  %v61_v5 = vld [vmem:[#allocation5 + $0x50] sm:$0xff]  ;;  %v60_v6 = vld [vmem:[#allocation5 + $0x48] sm:$0xff]  ;;  %v59_v7 = vld [vmem:[#allocation5 + $0x40] sm:$0xff] }
   0xf   :  { %128 = vmatpush.msra.mxu2 %v65_v1  ;;  %129 = vmatpush.msra.mxu3 %v65_v1  ;;  %v58_v8 = vld [vmem:[#allocation5 + $0x38] sm:$0xff]  ;;  %v57_v9 = vld [vmem:[#allocation5 + $0x30] sm:$0xff]  ;;  %v56_v10 = vld [vmem:[#allocation5 + $0x28] sm:$0xff] }
  0x10   :  { %72 = vmatpush.msra.mxu0 %v65_v1  ;;  %127 = vmatpush.msra.mxu1 %v65_v1  ;;  %v55_v11 = vld [vmem:[#allocation5 + $0x20] sm:$0xff]  ;;  %v54_v12 = vld [vmem:[#allocation5 + $0x18] sm:$0xff]  ;;  %v53_v13 = vld [vmem:[#allocation5 + $0x10] sm:$0xff] }
  0x11   :  { %131 = vmatpush.msra.mxu2 %v64_v2  ;;  %132 = vmatpush.msra.mxu3 %v64_v2  ;;  %v52_v14 = vld [vmem:[#allocation5 + $0x8] sm:$0xff]  ;;  %v51_v15 = vld [vmem:[#allocation5] sm:$0xff]  ;;  %v49_v16 = vld [vmem:[#allocation2 + $0x10] sm:$0xff] }
  0x12   :  { %73 = vmatpush.msra.mxu0 %v64_v2  ;;  %130 = vmatpush.msra.mxu1 %v64_v2  ;;  %v50_v17 = vld [vmem:[#allocation2 + $0x18] sm:$0xff]  ;;  %v47_v18 = vld [vmem:[#allocation2] sm:$0xff]  ;;  %v48_v19 = vld [vmem:[#allocation2 + $0x8] sm:$0xff] }
  0x13   :  { %134 = vmatpush.msra.mxu2 %v63_v3  ;;  %135 = vmatpush.msra.mxu3 %v63_v3  ;;  %v177_v20 = vld [vmem:[%s304_s2] ss:$0 sm:$0xff] }
  0x14   :  { %74 = vmatpush.msra.mxu0 %v63_v3  ;;  %133 = vmatpush.msra.mxu1 %v63_v3 }
  0x15   :  { %137 = vmatpush.msra.mxu2 %v62_v4  ;;  %138 = vmatpush.msra.mxu3 %v62_v4 }
  0x16   :  { %75 = vmatpush.msra.mxu0 %v62_v4  ;;  %136 = vmatpush.msra.mxu1 %v62_v4 }
  0x17   :  { %140 = vmatpush.msra.mxu2 %v61_v5  ;;  %141 = vmatpush.msra.mxu3 %v61_v5 }
  0x18   :  { %76 = vmatpush.msra.mxu0 %v61_v5  ;;  %139 = vmatpush.msra.mxu1 %v61_v5 }
  0x19   :  { %143 = vmatpush.msra.mxu2 %v60_v6  ;;  %144 = vmatpush.msra.mxu3 %v60_v6 }
  0x1a   :  { %77 = vmatpush.msra.mxu0 %v60_v6  ;;  %142 = vmatpush.msra.mxu1 %v60_v6 }
  0x1b   :  { %146 = vmatpush.msra.mxu2 %v59_v7  ;;  %147 = vmatpush.msra.mxu3 %v59_v7 }
  0x1c   :  { %78 = vmatpush.msra.mxu0 %v59_v7  ;;  %145 = vmatpush.msra.mxu1 %v59_v7 }
  0x1d   :  { %149 = vmatpush.msra.mxu2 %v58_v8  ;;  %150 = vmatpush.msra.mxu3 %v58_v8 }
  0x1e   :  { %79 = vmatpush.msra.mxu0 %v58_v8  ;;  %148 = vmatpush.msra.mxu1 %v58_v8 }
  0x1f   :  { %152 = vmatpush.msra.mxu2 %v57_v9  ;;  %153 = vmatpush.msra.mxu3 %v57_v9 }
  0x20   :  { %80 = vmatpush.msra.mxu0 %v57_v9  ;;  %151 = vmatpush.msra.mxu1 %v57_v9 }
  0x21   :  { %155 = vmatpush.msra.mxu2 %v56_v10  ;;  %156 = vmatpush.msra.mxu3 %v56_v10 }
  0x22   :  { %81 = vmatpush.msra.mxu0 %v56_v10  ;;  %154 = vmatpush.msra.mxu1 %v56_v10 }
  0x23   :  { %158 = vmatpush.msra.mxu2 %v55_v11  ;;  %159 = vmatpush.msra.mxu3 %v55_v11 }
  0x24   :  { %82 = vmatpush.msra.mxu0 %v55_v11  ;;  %157 = vmatpush.msra.mxu1 %v55_v11 }
  0x25   :  { %161 = vmatpush.msra.mxu2 %v54_v12  ;;  %162 = vmatpush.msra.mxu3 %v54_v12 }
  0x26   :  { %83 = vmatpush.msra.mxu0 %v54_v12  ;;  %160 = vmatpush.msra.mxu1 %v54_v12 }
  0x27   :  { %164 = vmatpush.msra.mxu2 %v53_v13  ;;  %165 = vmatpush.msra.mxu3 %v53_v13 }
  0x28   :  { %84 = vmatpush.msra.mxu0 %v53_v13  ;;  %163 = vmatpush.msra.mxu1 %v53_v13 }
  0x29   :  { %167 = vmatpush.msra.mxu2 %v52_v14  ;;  %168 = vmatpush.msra.mxu3 %v52_v14 }
  0x2a   :  { %85 = vmatpush.msra.mxu0 %v52_v14  ;;  %166 = vmatpush.msra.mxu1 %v52_v14 }
  0x2b   :  { %170 = vmatpush.msra.mxu2 %v51_v15  ;;  %171 = vmatpush.msra.mxu3 %v51_v15 }
  0x2c   :  { %93 = vmatmul.f32.vlgmr.msra.gmra.mxu2 %v49_v16  ;;  %96 = vmatmul.f32.vlgmr.msra.gmra.mxu3 %v50_v17 }
  0x2d   :  { %86 = vmatpush.msra.mxu0 %v51_v15  ;;  %169 = vmatpush.msra.mxu1 %v51_v15 }
  0x2e   :  { %87 = vmatmul.f32.vlgmr.msra.gmra.mxu0 %v47_v18  ;;  %90 = vmatmul.f32.vlgmr.msra.gmra.mxu1 %v48_v19 }
  0xab   :  { %v88_v21 = vpop.f32.mrf.mxu0  ;;  %v91_v22 = vpop.f32.mrf.mxu1 }
  0xac   :  { %v89_v23 = vadd.f32 %v177_v20, %v88_v21  ;;  %v92_v24 = vadd.f32 %v177_v20, %v91_v22 }
  0xae   :  { %100 = vst [vmem:[#allocation7] sm:$0xff] %v89_v23 }
  0xaf   :  { %101 = vst [vmem:[#allocation7 + $0x8] sm:$0xff] %v92_v24  ;;  %v94_v25 = vpop.f32.mrf.mxu2  ;;  %v97_v26 = vpop.f32.mrf.mxu3 }
  0xb0   :  { %v95_v27 = vadd.f32 %v177_v20, %v94_v25  ;;  %v98_v28 = vadd.f32 %v177_v20, %v97_v26 }
  0xb2   :  { %102 = vst [vmem:[#allocation7 + $0x10] sm:$0xff] %v95_v27 }
  0xb3   :  { %103 = vst [vmem:[#allocation7 + $0x18] sm:$0xff] %v98_v28 }
  0xb4   :  { %116 = dma.vmem_to_hbm [thread:$0]  %s109_s25, 512, %s111_s28, [#allocation4], %s257_s20, %s257_s20, %s258_s21  }
  0xb5   :  { %254 = dma.done.wait [#allocation4], 512  }
  0xb6   :  { %255 = vsyncadd [#allocation4], 4294966784 }
  0xb7   :  { %121 = vsyncpa [#allocation3], 1 }
  0xb8   :  { %122 = vsyncpa [#allocation6], 1 }
  0xb9   :  { %123 = vsyncpa [#allocation4], 1 }

</bundles_post_ra>
